<compile_context>
chip_gen: v6e
topology: v6e:2x2x1
jax: 0.10.0
libtpu: 0.0.40
codegen_flags: <defaults>
</compile_context>

<pallas_src>
import jax
import jax.numpy as jnp
from jax.experimental import pallas as pl
from jax.experimental.pallas import tpu as pltpu

# Lane width used when the input must be flattened and padded (ragged tail).
_FLAT_LANES = 1024
# Candidate lane widths (largest first) for a pad-free flatten.
_LANE_CANDIDATES = (1024, 512, 256, 128)
# Per-tile byte budget: ~4 MiB/tile -> <= ~16 MiB with double-buffered in+out.
_TILE_BYTES_TARGET = 4 * 1024 * 1024
# Explicit scoped-VMEM limit with headroom on all of v5e / v6e / v7x.
_VMEM_LIMIT_BYTES = 48 * 1024 * 1024
# Below this element count a fused XLA expression beats a Pallas dispatch.
_SMALL_N = 1 << 20


def _critic_kernel(p_ref, a_ref, o_ref):
    # p_ref: (1, 1) scalar parameter in SMEM
    # a_ref / o_ref: (tile_r, lanes) tile in VMEM
    a = a_ref[...].astype(jnp.float32)
    o_ref[...] = (a * a * p_ref[0, 0]).astype(o_ref.dtype)


def _sublane_min(dtype) -> int:
    # f32 -> 8, bf16/f16 -> 16, int8/fp8 -> 32 (native sublane packing).
    return max(8, 32 // jnp.dtype(dtype).itemsize)


def _pick_tile_rows(rows: int, lanes: int, itemsize: int, sub_min: int) -> int:
    if rows <= 2 * sub_min:
        return rows  # single block whose shape equals the full array dims
    # Largest tile within the byte budget, rounded down to the sublane multiple.
    budget = max(sub_min,
                 (_TILE_BYTES_TARGET // (lanes * itemsize)) // sub_min * sub_min)
    # Guarantee >= 2 grid steps so v7x's two TensorCores both get work.
    half = -(-rows // 2)
    half = -(-half // sub_min) * sub_min
    return min(budget, half)


def critic_forward(action: jax.Array, quadratic_p: jax.Array,
                   *, force_pallas: bool = False) -> jax.Array:
    """Critic forward pass: action ** 2 * quadraticP.

    action: arbitrary-shaped float array; quadratic_p: (1,) float32.
    Returns an array with the same shape/dtype as `action`.
    """
    orig_shape = action.shape
    orig_dtype = action.dtype
    n = action.size

    # Tiny inputs: the fused XLA expression is already roofline-bound; Pallas
    # dispatch + pipeline prologue would dominate.
    if n == 0 or (n < _SMALL_N and not force_pallas):
        return (action.astype(jnp.float32) ** 2
                * quadratic_p.astype(jnp.float32).reshape(())).astype(orig_dtype)

    itemsize = jnp.dtype(orig_dtype).itemsize
    sub_min = _sublane_min(orig_dtype)

    padded = False
    if (action.ndim >= 2 and orig_shape[-1] % 128 == 0
            and orig_shape[-1] * itemsize <= _TILE_BYTES_TARGET):
        # Fast path: free collapse of leading dims, keep the lane-dense last dim.
        lanes = orig_shape[-1]
        rows = n // lanes
        x2d = action.reshape(rows, lanes)
    else:
        flat = action.reshape(-1)
        lanes = next((c for c in _LANE_CANDIDATES if n % c == 0), None)
        if lanes is not None:
            # Pad-free flatten to a lane-dense 2-D slab.
            rows = n // lanes
            x2d = flat.reshape(rows, lanes)
        else:
            # Truly ragged: pad only the sub-lane remainder (< _FLAT_LANES elems).
            lanes = _FLAT_LANES
            rows = -(-n // lanes)
            flat = jnp.pad(flat, (0, rows * lanes - n))
            x2d = flat.reshape(rows, lanes)
            padded = True

    tile_r = _pick_tile_rows(rows, lanes, itemsize, sub_min)
    grid = (pl.cdiv(rows, tile_r),)  # ragged last block handled by Pallas masking
    p2d = quadratic_p.reshape(1, 1).astype(jnp.float32)

    out2d = pl.pallas_call(
        _critic_kernel,
        out_shape=jax.ShapeDtypeStruct((rows, lanes), orig_dtype),
        grid=grid,
        in_specs=[
            pl.BlockSpec(memory_space=pltpu.SMEM),             # scalar param
            pl.BlockSpec((tile_r, lanes), lambda i: (i, 0)),   # batch tile in VMEM
        ],
        out_specs=pl.BlockSpec((tile_r, lanes), lambda i: (i, 0)),
        compiler_params=pltpu.CompilerParams(
            dimension_semantics=("parallel",),                  # shard tiles across TCs
            vmem_limit_bytes=_VMEM_LIMIT_BYTES,
        ),
    )(p2d, x2d)

    if padded:
        return out2d.reshape(-1)[:n].reshape(orig_shape)
    return out2d.reshape(orig_shape)


# TODO(synk): Critic.update() (Adam step on sum(delta_rwd**2)) is a training-time
# optimizer routine with no forward-pass Pallas equivalent; not implemented here.


if __name__ == "__main__":
    key = jax.random.PRNGKey(0)
    k_p, k_a, k_b, k_c = jax.random.split(key, 4)

    # Deterministic parameter init, mirroring torch.randn(1) ** 2
    quadratic_p = jax.random.normal(k_p, (1,), dtype=jnp.float32) ** 2

    # 1) Small, lane-aligned action batch (fast path, single full-array block).
    action = jax.random.normal(k_a, (8, 128), dtype=jnp.float32)
    out = jax.block_until_ready(critic_forward(action, quadratic_p, force_pallas=True))
    ref = action ** 2 * quadratic_p[0]
    assert out.shape == action.shape and out.dtype == action.dtype
    assert jnp.allclose(out, ref, atol=1e-6, rtol=1e-6)

    # 2) Odd (non-lane-aligned) shape exercises the pad-remainder + slice path.
    action_odd = jax.random.normal(k_b, (37, 19), dtype=jnp.float32)
    out_odd = jax.block_until_ready(critic_forward(action_odd, quadratic_p, force_pallas=True))
    ref_odd = action_odd ** 2 * quadratic_p[0]
    assert out_odd.shape == action_odd.shape
    assert jnp.allclose(out_odd, ref_odd, atol=1e-6, rtol=1e-6)

    # 3) Multi-step grid with a ragged last block (>= 2 tiles for v7x megacore).
    action_big = jax.random.normal(k_c, (6, 28, 128), dtype=jnp.float32)
    out_big = jax.block_until_ready(critic_forward(action_big, quadratic_p, force_pallas=True))
    ref_big = action_big ** 2 * quadratic_p[0]
    assert out_big.shape == action_big.shape
    assert jnp.allclose(out_big, ref_big, atol=1e-6, rtol=1e-6)

    print("KERNEL_OK")
</pallas_src>

<mosaic_0001>
module attributes {stable_mosaic.version = 11 : i64} {
  func.func @_critic_kernel(%arg0: i32, %arg1: memref<1x1xf32, #tpu.memory_space<smem>>, %arg2: memref<8x128xf32, #tpu.memory_space<vmem>>, %arg3: memref<8x128xf32, #tpu.memory_space<vmem>>) attributes {dimension_semantics = [#tpu.dimension_semantics<parallel>], iteration_bounds = array<i64: 1>, scalar_prefetch = 0 : i64, scratch_operands = 0 : i64, tpu.core_type = #tpu.core_type<tc>, window_params = [{transform_indices = @transform_0, window_bounds = array<i64: 1, 1>}, {transform_indices = @transform_1, window_bounds = array<i64: 8, 128>}, {transform_indices = @transform_2, window_bounds = array<i64: 8, 128>}]} {
    %c0 = arith.constant 0 : index
    %c0_0 = arith.constant 0 : index
    %0 = vector.load %arg2[%c0, %c0_0] : memref<8x128xf32, #tpu.memory_space<vmem>>, vector<8x128xf32>
    %1 = arith.mulf %0, %0 : vector<8x128xf32>
    %c0_1 = arith.constant 0 : index
    %c0_2 = arith.constant 0 : index
    %2 = memref.load %arg1[%c0_1, %c0_2] : memref<1x1xf32, #tpu.memory_space<smem>>
    %3 = vector.broadcast %2 : f32 to vector<8x128xf32>
    %4 = arith.mulf %1, %3 : vector<8x128xf32>
    %c0_3 = arith.constant 0 : index
    %c0_4 = arith.constant 0 : index
    %5 = vector.load %arg3[%c0_3, %c0_4] : memref<8x128xf32, #tpu.memory_space<vmem>>, vector<8x128xf32>
    tpu.vector_store %arg3[%c0_3, %c0_4], %4 {strides = array<i32>} : memref<8x128xf32, #tpu.memory_space<vmem>>, vector<8x128xf32>,
    return
  }
  func.func @transform_0(%arg0: i32) -> (i32, i32) {
    %c0_i32 = arith.constant 0 : i32
    %c0_i32_0 = arith.constant 0 : i32
    %c0_i32_1 = arith.constant 0 : i32
    return %c0_i32, %c0_i32_0 : i32, i32
  }
  func.func @transform_1(%arg0: i32) -> (i32, i32) {
    %c0_i32 = arith.constant 0 : i32
    %c0_i32_0 = arith.constant 0 : i32
    return %arg0, %c0_i32 : i32, i32
  }
  func.func @transform_2(%arg0: i32) -> (i32, i32) {
    %c0_i32 = arith.constant 0 : i32
    %c0_i32_0 = arith.constant 0 : i32
    return %arg0, %c0_i32 : i32, i32
  }
}

</mosaic_0001>

<bundles_post_ra>
// kernel: tpu_custom_call.1
= control target key start
LH: loop header
LB: loop body
LE: loop exit
PB: predicated region body
PF: predicated region fallthrough
CT: control target
= control target key end

     0   :  { %8 = vsyncpa [#allocation4], 0  ;;  %s118_s0 = inlined_call_operand.<no memory space> [shape: f32[1,1], index: 0, kind: input, shape index: {}]   ;;  %s119_s1 = inlined_call_operand.hbm [shape: f32[8,128], index: 1, kind: input, shape index: {}]   ;;  %s120_s2 = inlined_call_operand.hbm [shape: f32[8,128], index: 2, kind: output, shape index: {}]  }
   0x1   :  { %9 = vsyncpa [#allocation5], 0  ;;  %s92_s9 = smov [#allocation3]  }
   0x2   :  { %s18_s10 = sshll.u32 %s92_s9, 4  ;;  %s19_s10 = int_to_ptr.vmem [resolvable:$true] %s18_s10 }
   0x3   :  { %s56_s11 = scalar_lea.vmem %s19_s10, 128  ;;  %p61_p1 = scmp.lt.s32.totalorder %s19_s10, %s19_s10 }
   0x4   :  { %p57_p0 = scmp.ne.s32.totalorder %s19_s10, %s56_s11  ;;  %p62_p2 = scmp.lt.s32.totalorder %s56_s11, %s56_s11 }
   0x6   :  { %p63_p3 = por %p62_p2, %p61_p1 }
   0x8   :  { %p64_p4 = pnand %p63_p3, %p57_p0 }
   0xa   :  { %67 = shalt.err (!%p64_p4)
}
   0xb   :  { %21 = dma.hbm_to_vmem [thread:$0]  %s119_s1, 128, %s19_s10, [#allocation4]  }
   0xc   :  { %88 = dma.done.wait [#allocation4], 128  }
   0xd   :  { %89 = vsyncadd [#allocation4], 4294967168  ;;  %v25_v0 = vld [vmem:[#allocation3] sm:$0xff]  ;;  %v28_v1 = vstv %s118_s0  ;;  %s93_s16 = smov [#allocation6]  }
   0xe   :  { %s37_s17 = sshll.u32 %s93_s16, 4  ;;  %v26_v2 = vmul.f32 %v25_v0, %v25_v0  ;;  %s38_s17 = int_to_ptr.vmem [resolvable:$true] %s37_s17 }
   0xf   :  { %s68_s18 = scalar_lea.vmem %s38_s17, 128  ;;  %p73_p6 = scmp.lt.s32.totalorder %s38_s17, %s38_s17 }
  0x10   :  { %v29_v3 = vmul.f32 %v28_v1, %v26_v2  ;;  %p69_p5 = scmp.ne.s32.totalorder %s38_s17, %s68_s18  ;;  %p74_p7 = scmp.lt.s32.totalorder %s68_s18, %s68_s18 }
  0x12   :  { %30 = vst [vmem:[#allocation6] sm:$0xff] %v29_v3  ;;  %p75_p8 = por %p74_p7, %p73_p6 }
  0x14   :  { %p76_p9 = pnand %p75_p8, %p69_p5 }
  0x16   :  { %79 = shalt.err (!%p76_p9)
}
  0x17   :  { %40 = dma.vmem_to_hbm [thread:$0]  %s38_s17, 128, %s120_s2, [#allocation5]  }
  0x18   :  { %90 = dma.done.wait [#allocation5], 128  }
  0x19   :  { %91 = vsyncadd [#allocation5], 4294967168 }
  0x1a   :  { %44 = vsyncpa [#allocation4], 1 }
  0x1b   :  { %45 = vsyncpa [#allocation5], 1 }

</bundles_post_ra>
